<compile_context>
chip_gen: v7x
topology: tpu7x:2x2x1
jax: 0.10.0
libtpu: 0.0.40
codegen_flags: <defaults>
</compile_context>

<pallas_src>
import functools

import jax
import jax.numpy as jnp
from jax import lax
from jax.experimental import pallas as pl
from jax.experimental.pallas import tpu as pltpu


def _round_up(x: int, m: int) -> int:
    return ((x + m - 1) // m) * m


# Conservative per-call VMEM budget: fits v7x's 32 MiB scoped default with
# headroom; v5e/v6e have larger VMEM so the same tiles are safe everywhere.
_VMEM_BUDGET_BYTES = 24 * 1024 * 1024
_VMEM_LIMIT_BYTES = 32 * 1024 * 1024


def _attention_kernel(h_ref, wt_ref, o_ref, *, n_valid: int, sent_pad: int):
    # h_ref : (TILE_BS, dim)       VMEM
    # wt_ref: (dim, SENT_PAD)      VMEM — weight pre-transposed: native NN matmul,
    #                              lane-dense (SENT_PAD % 128 == 0), VMEM-resident
    #                              across grid steps (constant index_map).
    # o_ref : (TILE_BS, SENT_PAD)  VMEM — lane-dense, unmasked full-width stores.
    logits = jnp.dot(
        h_ref[...], wt_ref[...], preferred_element_type=jnp.float32
    )  # (TILE_BS, SENT_PAD) f32

    if n_valid != sent_pad:
        # Only emitted when there really is column padding.  (1, SENT_PAD) iota
        # + broadcast keeps iota/compare traffic to a single sublane row.
        col = lax.broadcasted_iota(jnp.int32, (1, sent_pad), 1)
        logits = jnp.where(col < n_valid, logits, -1e30)

    # Numerically-stable softmax along the lane axis.  Exact normalization so
    # every valid row sums to 1 to f32 rounding (padded columns contribute
    # exp(-huge) == 0 to the denominator).
    m = jnp.max(logits, axis=-1, keepdims=True)
    e = jnp.exp(logits - m)
    denom = jnp.sum(e, axis=-1, keepdims=True)          # (TILE_BS, 1)
    inv = 1.0 / denom                                    # exact; tiny array
    o_ref[...] = (e * inv).astype(o_ref.dtype)


def attention_forward(h_t, h_s, weight, input_feed=False, tile_bs=512):
    """
    h_t:    (bs, 1, dim)      float32
    h_s:    (bs, seq_s, dim)  float32 (only its shape is used in the reference)
    weight: (max_sent, dim)   float32 (nn.Linear weight, PyTorch convention)
    returns (bs, 1, max_sent) float32
    """
    del h_s  # not used by the math in the reference forward
    # TODO(synk): input_feed=True branch references an undefined `score` in the
    # reference module; only the input_feed=False path is implementable.
    assert not input_feed

    bs, one, dim = h_t.shape
    assert one == 1
    max_sent = weight.shape[0]

    # Lane-dense output width.
    sent_pad = _round_up(max_sent, 128)

    # Weight transpose + pad happens here per call for a self-contained script;
    # in production do it ONCE at parameter-init time (off the hot path).
    w_t = weight.T  # (dim, max_sent)
    if sent_pad != max_sent:
        w_t = jnp.pad(w_t, ((0, 0), (0, sent_pad - max_sent)))

    # Batch tile: sublane-aligned, as large as the VMEM budget allows (kernel
    # is HBM-store bound; big tiles amortize the ~0.35us per-grid-step cost).
    bs_tile = min(tile_bs, _round_up(bs, 8))

    def _vmem_bytes(t):
        # double-buffered h + out tiles, weight counted double-buffered (worst case).
        return 4 * (2 * t * (dim + sent_pad) + 2 * dim * sent_pad)

    while bs_tile > 8 and _vmem_bytes(bs_tile) > _VMEM_BUDGET_BYTES:
        bs_tile = _round_up(bs_tile // 2, 8)
    bs_pad = _round_up(bs, bs_tile)

    # v7x has 2 TensorCores: give the "parallel" batch axis >= 2 grid steps
    # whenever the batch is big enough to split (no effect on v5e/v6e).
    if bs_pad // bs_tile < 2 and bs_pad >= 16:
        bs_tile = _round_up(bs_pad // 2, 8)
        bs_pad = _round_up(bs, bs_tile)
    grid = (bs_pad // bs_tile,)

    h2d = h_t.reshape(bs, dim)
    if bs_pad != bs:
        h2d = jnp.pad(h2d, ((0, bs_pad - bs), (0, 0)))

    kernel = functools.partial(
        _attention_kernel, n_valid=max_sent, sent_pad=sent_pad
    )

    cost = pl.CostEstimate(
        flops=2 * bs_pad * dim * sent_pad,
        transcendentals=bs_pad * sent_pad,
        bytes_accessed=4 * (bs_pad * dim + dim * sent_pad + bs_pad * sent_pad),
    )

    out = pl.pallas_call(
        kernel,
        out_shape=jax.ShapeDtypeStruct((bs_pad, sent_pad), h_t.dtype),
        grid=grid,
        in_specs=[
            pl.BlockSpec((bs_tile, dim), lambda i: (i, 0)),       # h tile per step
            pl.BlockSpec((dim, sent_pad), lambda i: (0, 0)),      # weight, constant block
        ],
        out_specs=pl.BlockSpec((bs_tile, sent_pad), lambda i: (i, 0)),
        compiler_params=pltpu.CompilerParams(
            dimension_semantics=("parallel",),
            vmem_limit_bytes=_VMEM_LIMIT_BYTES,
        ),
        cost_estimate=cost,
    )(h2d, w_t)

    if bs_pad != bs or sent_pad != max_sent:
        out = out[:bs, :max_sent]
    return out.reshape(bs, 1, max_sent)


if __name__ == "__main__":
    # Small shapes consistent with the module's forward.
    bs = 2
    lstm_dim = 32      # dim
    max_sent = 8       # output size of att_score Linear
    seq_s = 8

    key = jax.random.PRNGKey(0)
    k_w, k_ht, k_hs = jax.random.split(key, 3)

    # Deterministic "init_weights": uniform(-0.1, 0.1), shape (max_sent, lstm_dim)
    weight = jax.random.uniform(
        k_w, (max_sent, lstm_dim), dtype=jnp.float32, minval=-0.1, maxval=0.1
    )
    h_t = jax.random.normal(k_ht, (bs, 1, lstm_dim), dtype=jnp.float32)
    h_s = jax.random.normal(k_hs, (bs, seq_s, lstm_dim), dtype=jnp.float32)

    out = attention_forward(h_t, h_s, weight, input_feed=False)
    out = jax.block_until_ready(out)

    # Sanity check against a pure-JAX reference of the same math.
    ref = jax.nn.softmax(
        jnp.einsum("bod,md->bom", h_t, weight,
                   precision=jax.lax.Precision.HIGHEST),
        axis=-1,
    )
    assert out.shape == (bs, 1, max_sent)
    assert jnp.allclose(out, ref, atol=2e-3, rtol=2e-3)
    # Exact normalization: each row sums to 1 to f32 rounding.
    assert jnp.allclose(jnp.sum(out, axis=-1), 1.0, atol=1e-4)

    print("KERNEL_OK")
</pallas_src>

<mosaic_0001>
module attributes {stable_mosaic.version = 11 : i64} {
  func.func @_attention_kernel(%arg0: i32, %arg1: memref<8x32xf32, #tpu.memory_space<vmem>>, %arg2: memref<32x128xf32, #tpu.memory_space<vmem>>, %arg3: memref<8x128xf32, #tpu.memory_space<vmem>>) attributes {dimension_semantics = [#tpu.dimension_semantics<parallel>], iteration_bounds = array<i64: 1>, scalar_prefetch = 0 : i64, scratch_operands = 0 : i64, tpu.core_type = #tpu.core_type<tc>, window_params = [{transform_indices = @transform_0, window_bounds = array<i64: 8, 32>}, {pipeline_mode = #tpu.pipeline_mode<synchronous>, transform_indices = @transform_1, window_bounds = array<i64: 32, 128>}, {transform_indices = @transform_2, window_bounds = array<i64: 8, 128>}]} {
    %c0 = arith.constant 0 : index
    %c0_0 = arith.constant 0 : index
    %0 = vector.load %arg1[%c0, %c0_0] : memref<8x32xf32, #tpu.memory_space<vmem>>, vector<8x32xf32>
    %c0_1 = arith.constant 0 : index
    %c0_2 = arith.constant 0 : index
    %1 = vector.load %arg2[%c0_1, %c0_2] : memref<32x128xf32, #tpu.memory_space<vmem>>, vector<32x128xf32>
    %cst = arith.constant dense<0.000000e+00> : vector<8x128xf32>
    %2 = tpu.matmul %0, %1, %cst {dimension_numbers = #tpu.dot_dimension_numbers<[1], [0], [0], [1], [0, 0, 1, 1], [], []>} : vector<8x32xf32>, vector<32x128xf32>, vector<8x128xf32> -> vector<8x128xf32>
    %3 = tpu.iota {dimensions = array<i32: 1>} : vector<1x128xi32>
    %c8_i32 = arith.constant 8 : i32
    %4 = vector.broadcast %c8_i32 : i32 to vector<1x128xi32>
    %5 = arith.cmpi slt, %3, %4 : vector<1x128xi32>
    %cst_3 = arith.constant -1.000000e+30 : f32
    %6 = vector.shape_cast %5 : vector<1x128xi1> to vector<1x128xi1>
    %7 = vector.broadcast %6 : vector<1x128xi1> to vector<8x128xi1>
    %8 = vector.broadcast %cst_3 : f32 to vector<8x128xf32>
    %9 = arith.select %7, %2, %8 : vector<8x128xi1>, vector<8x128xf32>
    %cst_4 = arith.constant dense<0xFF800000> : vector<8xf32>
    %10 = vector.multi_reduction <maximumf>, %9, %cst_4 [1] : vector<8x128xf32> to vector<8xf32>
    %11 = vector.shape_cast %10 : vector<8xf32> to vector<8x1xf32>
    %12 = vector.broadcast %11 : vector<8x1xf32> to vector<8x128xf32>
    %13 = arith.subf %9, %12 : vector<8x128xf32>
    %14 = math.exp %13 : vector<8x128xf32>
    %cst_5 = arith.constant dense<0.000000e+00> : vector<8xf32>
    %15 = vector.multi_reduction <add>, %14, %cst_5 [1] : vector<8x128xf32> to vector<8xf32>
    %16 = vector.shape_cast %15 : vector<8xf32> to vector<8x1xf32>
    %cst_6 = arith.constant 1.000000e+00 : f32
    %17 = vector.broadcast %cst_6 : f32 to vector<8x1xf32>
    %18 = arith.divf %17, %16 : vector<8x1xf32>
    %19 = vector.broadcast %18 : vector<8x1xf32> to vector<8x128xf32>
    %20 = arith.mulf %14, %19 : vector<8x128xf32>
    %c0_7 = arith.constant 0 : index
    %c0_8 = arith.constant 0 : index
    %21 = vector.load %arg3[%c0_7, %c0_8] : memref<8x128xf32, #tpu.memory_space<vmem>>, vector<8x128xf32>
    tpu.vector_store %arg3[%c0_7, %c0_8], %20 {strides = array<i32>} : memref<8x128xf32, #tpu.memory_space<vmem>>, vector<8x128xf32>,
    return
  }
  func.func @transform_0(%arg0: i32) -> (i32, i32) {
    %c0_i32 = arith.constant 0 : i32
    %c0_i32_0 = arith.constant 0 : i32
    return %arg0, %c0_i32 : i32, i32
  }
  func.func @transform_1(%arg0: i32) -> (i32, i32) {
    %c0_i32 = arith.constant 0 : i32
    %c0_i32_0 = arith.constant 0 : i32
    %c0_i32_1 = arith.constant 0 : i32
    return %c0_i32, %c0_i32_0 : i32, i32
  }
  func.func @transform_2(%arg0: i32) -> (i32, i32) {
    %c0_i32 = arith.constant 0 : i32
    %c0_i32_0 = arith.constant 0 : i32
    return %arg0, %c0_i32 : i32, i32
  }
}

</mosaic_0001>

<bundles_post_ra>
// kernel: tpu_custom_call.1
= control target key start
LH: loop header
LB: loop body
LE: loop exit
PB: predicated region body
PF: predicated region fallthrough
CT: control target
= control target key end

     0   :  { %7 = vsyncpa [#allocation3], 0  ;;  %s323_s0 = inlined_call_operand.hbm [shape: f32[8,32], index: 0, kind: input, shape index: {}]   ;;  %s324_s1 = inlined_call_operand.hbm [shape: f32[32,128], index: 1, kind: input, shape index: {}]   ;;  %s325_s2 = inlined_call_operand.hbm [shape: f32[8,128], index: 2, kind: output, shape index: {}]  }
   0x1   :  { %8 = vsyncpa [#allocation6], 0 }
   0x2   :  { %9 = vsyncpa [#allocation4], 0  ;;  %s257_s9 = smov [#allocation2]   ;;  %s258_s11 = smov [#allocation5]  }
   0x3   :  { %s16_s10 = sshll.u32 %s257_s9, 4  ;;  %s25_s12 = sshll.u32 %s258_s11, 4  ;;  %s17_s10 = int_to_ptr.vmem [resolvable:$true] %s16_s10  ;;  %s280_s12 = int_to_ptr.vmem [resolvable:$true] %s25_s12 }
   0x4   :  { %s185_s15 = scalar_lea.hbm %s323_s0, 128 }
   0x5   :  { %p186_p0 = scmp.ne.s32.totalorder %s323_s0, %s185_s15  ;;  %p189_p1 = scmp.lt.u32.totalorder %s185_s15, %s323_s0 }
   0x7   :  { %p191_p2 = pnand %p189_p1, %p186_p0 }
   0x9   :  { %194 = shalt.err (!%p191_p2)
}
   0xa   :  { %s195_s20 = scalar_lea.vmem %s17_s10, 128  ;;  %p200_p4 = scmp.lt.s32.totalorder %s17_s10, %s17_s10 }
   0xb   :  { %p196_p3 = scmp.ne.s32.totalorder %s17_s10, %s195_s20  ;;  %p201_p5 = scmp.lt.s32.totalorder %s195_s20, %s195_s20 }
   0xd   :  { %p202_p6 = por %p201_p5, %p200_p4 }
   0xf   :  { %p203_p7 = pnand %p202_p6, %p196_p3 }
  0x11   :  { %206 = shalt.err (!%p203_p7)
}
  0x12   :  { %19 = dma.hbm_to_vmem [thread:$0]  %s323_s0, 128, %s17_s10, [#allocation3]  }
  0x13   :  { %s207_s25 = scalar_lea.hbm %s324_s1, 512 }
  0x14   :  { %p208_p8 = scmp.ne.s32.totalorder %s324_s1, %s207_s25  ;;  %p211_p9 = scmp.lt.u32.totalorder %s207_s25, %s324_s1 }
  0x16   :  { %p213_p10 = pnand %p211_p9, %p208_p8 }
  0x18   :  { %216 = shalt.err (!%p213_p10)
}
  0x19   :  { %s217_s30 = scalar_lea.vmem %s280_s12, 512  ;;  %p222_p12 = scmp.lt.s32.totalorder %s280_s12, %s280_s12 }
  0x1a   :  { %p218_p11 = scmp.ne.s32.totalorder %s280_s12, %s217_s30  ;;  %p223_p13 = scmp.lt.s32.totalorder %s217_s30, %s217_s30 }
  0x1c   :  { %p224_p0 = por %p223_p13, %p222_p12 }
  0x1e   :  { %p225_p1 = pnand %p224_p0, %p218_p11 }
  0x20   :  { %228 = shalt.err (!%p225_p1)
}
  0x21   :  { %s259_s0 = smov 128   ;;  %s260_s3 = smov 8  }
  0x22   :  { %31 = dma.hbm_to_vmem [thread:$0]  %s324_s1, 512, %s280_s12, [#allocation6], %s259_s0, %s259_s0, %s260_s3  }
  0x23   :  { %251 = dma.done.wait [#allocation3], 128  }
  0x24   :  { %252 = vsyncadd [#allocation3], 4294967168 }
  0x25   :  { %253 = dma.done.wait [#allocation6], 512  }
  0x26   :  { %254 = vsyncadd [#allocation6], 4294966784  ;;  %v261_v0 = vmov 0.0|0.0   ;;  %vm262_vm0 = vmmov 0   ;;  %v263_v1 = vmov 0.0   ;;  %v39_v2 = vld [vmem:[#allocation5] sm:$0xff]  ;;  %v117_v9 = vlaneseq }
  0x27   :  { %167 = vmatprep.subr.bf16.mxu0 %v261_v0  ;;  %164 = vmatprep.mubr.msk.f32.mxu0 %vm262_vm0, %v263_v1  ;;  %v40_v3 = vld [vmem:[#allocation5 + $0x8] sm:$0xff]  ;;  %v41_v4 = vld [vmem:[#allocation5 + $0x10] sm:$0xff]  ;;  %v42_v6 = vld [vmem:[#allocation5 + $0x18] sm:$0xff]  ;;  %vm43_vm1 = vcmask 261120   ;;  %s264_s1 = smov [#allocation7]  }
  0x28   :  { %v168_v5 = vpack.c.bf16 %v40_v3, %v39_v2  ;;  %v171_v7 = vpack.c.bf16 %v42_v6, %v41_v4  ;;  %v38_v8 = vld [vmem:[#allocation2] sm:$0xff]  ;;  %v118_v10 = vand.u32 127, %v117_v9  ;;  %s140_s6 = sshll.u32 %s264_s1, 4  ;;  %s141_s6 = int_to_ptr.vmem [resolvable:$true] %s140_s6 }
  0x29   :  { %s229_s7 = scalar_lea.vmem %s141_s6, 128  ;;  %p234_p3 = scmp.lt.s32.totalorder %s141_s6, %s141_s6 }
  0x2a   :  { %169 = vmatpush3.bf16.msra.mxu0 %v168_v5  ;;  %vm119_vm2 = vcmp.lt.s32.totalorder %v118_v10, 8  ;;  %p230_p2 = scmp.ne.s32.totalorder %s141_s6, %s229_s7  ;;  %p235_p4 = scmp.lt.s32.totalorder %s229_s7, %s229_s7 }
  0x2b   :  { %170 = vmatprep.subr.bf16.mxu0 %v261_v0 }
  0x2c   :  { %p236_p5 = por %p235_p4, %p234_p3 }
  0x2e   :  { %172 = vmatpush3.bf16.msra.mxu0 %v171_v7  ;;  %p237_p6 = pnand %p236_p5, %p230_p2 }
  0x31   :  { %165 = vmatmul.mubr.msk.f32.vlgmr.msra.gmra.mrb[0].mxu0 %vm43_vm1, %v38_v8 }
 0x104   :  { %v113_v11 = vpop.f32.mrb[0].mxu0 }
 0x105   :  { %v166_v12 = vpop.f32.mrb[1].mxu0  ;;  %v122_v13 = vsel %vm119_vm2, %v113_v11, -1e+30 }
 0x106   :  { %123 = vmax.xlane.f32.xlu0 %v122_v13 }
 0x193   :  { %v124_v14 = vpop.xlane.xlu0 %123 }
 0x194   :  { %v125_v15 = vsub.f32 %v122_v13, %v124_v14 }
 0x196   :  { %v126_v16 = vmul.f32 1.442695, %v125_v15 }
 0x198   :  { %181 = vpow2.f32 %v126_v16 }
 0x1a2   :  { %v182_v17 = vpop.eup %181 }
 0x1a3   :  { %128 = vadd.xlane.f32.xlu0 %v182_v17 }
 0x230   :  { %v129_v18 = vpop.xlane.xlu0 %128 }
 0x231   :  { %183 = vrcp.f32 %v129_v18 }
 0x23b   :  { %v184_v19 = vpop.eup %183 }
 0x23c   :  { %v132_v20 = vmul.f32 %v184_v19, %v182_v17 }
 0x23e   :  { %133 = vst [vmem:[#allocation7] sm:$0xff] %v132_v20 }
 0x23f   :  { %240 = shalt.err (!%p237_p6)
}
 0x240   :  { %s241_s10 = scalar_lea.hbm %s325_s2, 128 }
 0x241   :  { %p242_p7 = scmp.ne.s32.totalorder %s325_s2, %s241_s10  ;;  %p245_p8 = scmp.lt.u32.totalorder %s241_s10, %s325_s2 }
 0x243   :  { %p247_p9 = pnand %p245_p8, %p242_p7 }
 0x245   :  { %250 = shalt.err (!%p247_p9)
}
 0x246   :  { %143 = dma.vmem_to_hbm [thread:$0]  %s141_s6, 128, %s325_s2, [#allocation4]  }
 0x247   :  { %255 = dma.done.wait [#allocation4], 128  }
 0x248   :  { %256 = vsyncadd [#allocation4], 4294967168 }
 0x249   :  { %147 = vsyncpa [#allocation3], 1 }
 0x24a   :  { %148 = vsyncpa [#allocation6], 1 }
 0x24b   :  { %149 = vsyncpa [#allocation4], 1 }

</bundles_post_ra>
